<compile_context>
chip_gen: v7x
topology: tpu7x:2x2x1
jax: 0.10.0
libtpu: 0.0.40
codegen_flags: <defaults>
</compile_context>

<pallas_src>
import jax
import jax.numpy as jnp
from jax import lax
from jax.experimental import pallas as pl
from jax.experimental.pallas import tpu as pltpu  # noqa: F401  (TPU backend)


def _round_up(x, m):
    return ((x + m - 1) // m) * m


# ----------------------------------------------------------------------------
# Fused kernel: one-hot gather over the folded table -> tanh -> shifted head.
# ----------------------------------------------------------------------------
def _make_fused_kernel(*, B, S_pad, S_out, vocab, n_feats, V_pad, H_cat,
                       offsets, out_p):
    BS = B * S_pad

    def kernel(idx_ref, table_ref, enc_b_ref, head_w_ref, head_b_ref, out_ref):
        idx = idx_ref[...]                                    # [BS, 1+n_feats] i32
        iota_v = lax.broadcasted_iota(jnp.int32, (BS, V_pad), 1)

        # Fused embedding gather + encoder projection: one-hot over the folded
        # [word ; feat] table (exact row selection / summation on the MXU).
        # NOTE: out-of-range indices select nothing (zeros) whereas jnp.take
        # clamps; behaviour differs only on invalid inputs.
        oh = (idx[:, 0:1] == iota_v).astype(jnp.float32)
        for f in range(n_feats):
            oh = oh + ((idx[:, f + 1:f + 2] + vocab) == iota_v).astype(jnp.float32)

        enc = jnp.tanh(
            jnp.dot(oh, table_ref[...], preferred_element_type=jnp.float32)
            + enc_b_ref[...])                                 # [BS, H_cat]

        # create_x_in: the "+1" (current) offset is an exact superdiagonal
        # row-select matmul (rows never cross batch boundaries because the
        # last S_pad - S_out rows of each batch block are never read).
        xs = []
        if 0 in offsets:
            xs.append(enc)
        if 1 in offsets:
            r = lax.broadcasted_iota(jnp.int32, (BS, BS), 0)
            c = lax.broadcasted_iota(jnp.int32, (BS, BS), 1)
            shift_m = (c == r + 1).astype(jnp.float32)        # [BS, BS]
            xs.append(jnp.dot(shift_m, enc,
                              preferred_element_type=jnp.float32))

        # Head: one matmul per offset block against sublane-aligned row blocks
        # of the lane-padded weight; bias added exactly once.
        out_full = None
        row = 0
        for x_part in xs:
            c = jnp.dot(x_part, head_w_ref[row:row + H_cat],
                        preferred_element_type=jnp.float32)
            out_full = c if out_full is None else out_full + c
            row += H_cat
        out_full = out_full + head_b_ref[...]                 # [BS, out_p]

        # Lane-dense, sublane-aligned stores (b * S_pad is a multiple of 8).
        for b in range(B):
            out_ref[b] = out_full[b * S_pad:b * S_pad + S_out]

    return kernel


def fused_forward_pallas(idx, enc_table, enc_bias, head_w_pad, head_b_pad, *,
                         B, S_pad, S_out, vocab, offsets):
    """idx: [B*S_pad, 1+n_feats] i32; enc_table: [V_pad, H_cat];
    enc_bias: [1, H_cat]; head_w_pad: [len(offsets)*H_cat, OUT_P];
    head_b_pad: [1, OUT_P]  ->  [B, S_out, OUT_P] f32."""
    n_feats = idx.shape[1] - 1
    V_pad, H_cat = enc_table.shape
    out_p = head_w_pad.shape[1]

    kernel = _make_fused_kernel(
        B=B, S_pad=S_pad, S_out=S_out, vocab=vocab, n_feats=n_feats,
        V_pad=V_pad, H_cat=H_cat, offsets=offsets, out_p=out_p)

    # Gridless call: single invocation, whole (tiny) operands resident in VMEM.
    return pl.pallas_call(
        kernel,
        out_shape=jax.ShapeDtypeStruct((B, S_out, out_p), jnp.float32),
    )(idx, enc_table, enc_bias, head_w_pad, head_b_pad)


# ----------------------------------------------------------------------------
# DualTransformerModule (JAX / Pallas version)
# ----------------------------------------------------------------------------
class DualTransformerPallas:
    def __init__(self, key, vocab=50, n_feat=20, n_embed=32,
                 n_hidden_1=32, n_hidden_2=32, shift="both", out_dim=1):
        self.shift = shift
        self.out_dim = out_dim
        self.vocab = vocab
        self.n_feat = n_feat
        self.H1, self.H2 = n_hidden_1, n_hidden_2
        factor = 2 if shift == "both" else 1
        self.out_pad = _round_up(max(out_dim, 1), 128)
        ks = jax.random.split(key, 16)

        def normal(k, shape, scale=0.1):
            return (scale * jax.random.normal(k, shape)).astype(jnp.float32)

        # stand-in encoders (model_1 / model_2)
        self.word_embed_1 = normal(ks[0], (vocab, n_embed))
        self.feat_embed_1 = normal(ks[1], (n_feat, n_embed))
        self.enc_w_1 = normal(ks[2], (n_embed, n_hidden_1))
        self.enc_b_1 = normal(ks[3], (1, n_hidden_1))
        self.word_embed_2 = normal(ks[4], (vocab, n_embed))
        self.feat_embed_2 = normal(ks[5], (n_feat, n_embed))
        self.enc_w_2 = normal(ks[6], (n_embed, n_hidden_2))
        self.enc_b_2 = normal(ks[7], (1, n_hidden_2))

        # heads (match nn.Linear shapes; stored as [in, out]) -- distinct keys
        self.aj_w = normal(ks[8], (n_hidden_1 * factor, out_dim))
        self.aj_b = normal(ks[9], (1, out_dim))
        self.vanilla_w = normal(ks[10], (n_hidden_2 * factor, out_dim))
        self.vanilla_b = normal(ks[11], (1, out_dim))
        self.both_w = normal(ks[12], ((n_hidden_1 + n_hidden_2) * factor, out_dim))
        self.both_b = normal(ks[13], (1, out_dim))

        # --------- host-side folding / packing for the fused kernel ---------
        hi = lax.Precision.HIGHEST
        V_tot = vocab + n_feat
        self.V_pad = _round_up(V_tot, 128)

        def fold(we, fe, ew):
            # Everything before tanh is linear -> fold the encoder projection
            # into the embedding tables (exact up to f32 rounding).
            t = jnp.concatenate([jnp.dot(we, ew, precision=hi),
                                 jnp.dot(fe, ew, precision=hi)], axis=0)
            return jnp.pad(t, ((0, self.V_pad - V_tot), (0, 0)))

        t1 = fold(self.word_embed_1, self.feat_embed_1, self.enc_w_1)
        t2 = fold(self.word_embed_2, self.feat_embed_2, self.enc_w_2)

        lane_pad = ((0, 0), (0, self.out_pad - out_dim))
        self._packs = {
            "aj": (t1, self.enc_b_1,
                   jnp.pad(self.aj_w, lane_pad), jnp.pad(self.aj_b, lane_pad)),
            "vanilla": (t2, self.enc_b_2,
                        jnp.pad(self.vanilla_w, lane_pad),
                        jnp.pad(self.vanilla_b, lane_pad)),
            "both": (jnp.concatenate([t1, t2], axis=1),
                     jnp.concatenate([self.enc_b_1, self.enc_b_2], axis=1),
                     jnp.pad(self.both_w, lane_pad),
                     jnp.pad(self.both_b, lane_pad)),
        }

    def _offsets(self):
        if self.shift == "previous":
            return (0,)
        if self.shift == "current":
            return (1,)
        if self.shift == "both":
            return (0, 1)      # concat((x[:,0:-2], x[:,1:-1]), dim=2)
        raise Exception("unknown shift")

    def forward(self, words, feats, mode, use_vq=False):
        # TODO(synk): vq_forward of the sub-models is undefined; use_vq must be False.
        assert not use_vq
        qloss = 0.0

        if mode not in self._packs:
            raise Exception(f"Invalid mode '{mode}'")
        table, enc_b, head_w, head_b = self._packs[mode]

        B, S = words.shape
        S_pad = _round_up(S, 8)        # sublane-aligned per-batch offsets
        S_out = S - 2
        pad = ((0, 0), (0, S_pad - S))
        cols = [jnp.pad(words.astype(jnp.int32), pad)]
        cols += [jnp.pad(f.astype(jnp.int32), pad) for f in feats]
        idx = jnp.stack(cols, axis=-1).reshape(B * S_pad, len(cols))

        out_padded = fused_forward_pallas(
            idx, table, enc_b, head_w, head_b,
            B=B, S_pad=S_pad, S_out=S_out, vocab=self.vocab,
            offsets=self._offsets())
        out = out_padded[:, :, :self.out_dim]
        return out, qloss

    # plain-JAX reference (unfused, uses the raw unfolded tables)
    def forward_ref(self, words, feats, mode):
        xs = []
        if mode in ("aj", "both"):
            emb = jnp.take(self.word_embed_1, words, axis=0)
            for f in feats:
                emb = emb + jnp.take(self.feat_embed_1, f, axis=0)
            xs.append(jnp.tanh(emb @ self.enc_w_1 + self.enc_b_1))
        if mode in ("vanilla", "both"):
            emb = jnp.take(self.word_embed_2, words, axis=0)
            for f in feats:
                emb = emb + jnp.take(self.feat_embed_2, f, axis=0)
            xs.append(jnp.tanh(emb @ self.enc_w_2 + self.enc_b_2))
        x_cat = xs[0] if len(xs) == 1 else jnp.concatenate(xs, axis=2)
        if self.shift == "previous":
            x_in = x_cat[:, 0:-2]
        elif self.shift == "current":
            x_in = x_cat[:, 1:-1]
        else:
            x_in = jnp.concatenate((x_cat[:, 0:-2], x_cat[:, 1:-1]), axis=2)
        if mode == "aj":
            w, b = self.aj_w, self.aj_b
        elif mode == "vanilla":
            w, b = self.vanilla_w, self.vanilla_b
        else:
            w, b = self.both_w, self.both_b
        return x_in @ w + b


if __name__ == "__main__":
    key = jax.random.PRNGKey(0)
    k_mod, k_words, k_feat = jax.random.split(key, 3)

    B, S = 2, 10          # head output seq length = S - 2 = 8
    vocab, n_feat = 50, 20

    module = DualTransformerPallas(k_mod, vocab=vocab, n_feat=n_feat,
                                   n_embed=32, n_hidden_1=32, n_hidden_2=32,
                                   shift="both", out_dim=1)

    words = jax.random.randint(k_words, (B, S), 0, vocab, dtype=jnp.int32)
    feats = [jax.random.randint(k_feat, (B, S), 0, n_feat, dtype=jnp.int32)]

    ok = True
    for mode in ("aj", "vanilla", "both"):
        out, qloss = module.forward(words, feats, mode=mode, use_vq=False)
        out = jax.block_until_ready(out)
        ref = module.forward_ref(words, feats, mode)
        if out.shape != (B, S - 2, 1):
            ok = False
        if not jnp.allclose(out, ref, atol=5e-4, rtol=5e-4):
            ok = False

    if ok:
        print("KERNEL_OK")
    else:
        print("KERNEL_MISMATCH")
</pallas_src>

<mosaic_0001>
module attributes {stable_mosaic.version = 11 : i64} {
  func.func @kernel(%arg0: memref<32x2xi32, #tpu.memory_space<vmem>>, %arg1: memref<128x32xf32, #tpu.memory_space<vmem>>, %arg2: memref<1x32xf32, #tpu.memory_space<vmem>>, %arg3: memref<64x128xf32, #tpu.memory_space<vmem>>, %arg4: memref<1x128xf32, #tpu.memory_space<vmem>>, %arg5: memref<2x8x128xf32, #tpu.memory_space<vmem>>) attributes {dimension_semantics = [], scalar_prefetch = 0 : i64, scratch_operands = 0 : i64, tpu.core_type = #tpu.core_type<tc>} {
    %c0 = arith.constant 0 : index
    %c0_0 = arith.constant 0 : index
    %0 = vector.load %arg0[%c0, %c0_0] : memref<32x2xi32, #tpu.memory_space<vmem>>, vector<32x2xi32>
    %1 = tpu.iota {dimensions = array<i32: 1>} : vector<32x128xi32>
    %2 = vector.extract_strided_slice %0 {offsets = [0, 0], sizes = [32, 1], strides = [1, 1]} : vector<32x2xi32> to vector<32x1xi32>
    %3 = vector.broadcast %2 : vector<32x1xi32> to vector<32x128xi32>
    %4 = arith.cmpi eq, %3, %1 : vector<32x128xi32>
    %5 = arith.extui %4 : vector<32x128xi1> to vector<32x128xi32>
    %6 = arith.sitofp %5 : vector<32x128xi32> to vector<32x128xf32>
    %7 = vector.extract_strided_slice %0 {offsets = [0, 1], sizes = [32, 1], strides = [1, 1]} : vector<32x2xi32> to vector<32x1xi32>
    %c50_i32 = arith.constant 50 : i32
    %8 = vector.broadcast %c50_i32 : i32 to vector<32x1xi32>
    %9 = arith.addi %7, %8 : vector<32x1xi32>
    %10 = vector.broadcast %9 : vector<32x1xi32> to vector<32x128xi32>
    %11 = arith.cmpi eq, %10, %1 : vector<32x128xi32>
    %12 = arith.extui %11 : vector<32x128xi1> to vector<32x128xi32>
    %13 = arith.sitofp %12 : vector<32x128xi32> to vector<32x128xf32>
    %14 = arith.addf %6, %13 : vector<32x128xf32>
    %c0_1 = arith.constant 0 : index
    %c0_2 = arith.constant 0 : index
    %15 = vector.load %arg1[%c0_1, %c0_2] : memref<128x32xf32, #tpu.memory_space<vmem>>, vector<128x32xf32>
    %cst = arith.constant dense<0.000000e+00> : vector<32x32xf32>
    %16 = tpu.matmul %14, %15, %cst {dimension_numbers = #tpu.dot_dimension_numbers<[1], [0], [0], [1], [0, 0, 1, 1], [], []>} : vector<32x128xf32>, vector<128x32xf32>, vector<32x32xf32> -> vector<32x32xf32>
    %c0_3 = arith.constant 0 : index
    %c0_4 = arith.constant 0 : index
    %17 = vector.load %arg2[%c0_3, %c0_4] : memref<1x32xf32, #tpu.memory_space<vmem>>, vector<1x32xf32>
    %18 = vector.broadcast %17 : vector<1x32xf32> to vector<32x32xf32>
    %19 = arith.addf %16, %18 : vector<32x32xf32>
    %20 = math.tanh %19 : vector<32x32xf32>
    %21 = tpu.iota {dimensions = array<i32: 0>} : vector<32x32xi32>
    %22 = tpu.iota {dimensions = array<i32: 1>} : vector<32x32xi32>
    %c1_i32 = arith.constant 1 : i32
    %23 = vector.broadcast %c1_i32 : i32 to vector<32x32xi32>
    %24 = arith.addi %21, %23 : vector<32x32xi32>
    %25 = arith.cmpi eq, %22, %24 : vector<32x32xi32>
    %26 = arith.extui %25 : vector<32x32xi1> to vector<32x32xi32>
    %27 = arith.sitofp %26 : vector<32x32xi32> to vector<32x32xf32>
    %cst_5 = arith.constant dense<0.000000e+00> : vector<32x32xf32>
    %28 = tpu.matmul %27, %20, %cst_5 {dimension_numbers = #tpu.dot_dimension_numbers<[1], [0], [0], [1], [0, 0, 1, 1], [], []>} : vector<32x32xf32>, vector<32x32xf32>, vector<32x32xf32> -> vector<32x32xf32>
    %c0_6 = arith.constant 0 : index
    %c0_7 = arith.constant 0 : index
    %29 = vector.load %arg3[%c0_6, %c0_7] : memref<64x128xf32, #tpu.memory_space<vmem>>, vector<32x128xf32>
    %cst_8 = arith.constant dense<0.000000e+00> : vector<32x128xf32>
    %30 = tpu.matmul %20, %29, %cst_8 {dimension_numbers = #tpu.dot_dimension_numbers<[1], [0], [0], [1], [0, 0, 1, 1], [], []>} : vector<32x32xf32>, vector<32x128xf32>, vector<32x128xf32> -> vector<32x128xf32>
    %c32 = arith.constant 32 : index
    %c0_9 = arith.constant 0 : index
    %31 = vector.load %arg3[%c32, %c0_9] : memref<64x128xf32, #tpu.memory_space<vmem>>, vector<32x128xf32>
    %cst_10 = arith.constant dense<0.000000e+00> : vector<32x128xf32>
    %32 = tpu.matmul %28, %31, %cst_10 {dimension_numbers = #tpu.dot_dimension_numbers<[1], [0], [0], [1], [0, 0, 1, 1], [], []>} : vector<32x32xf32>, vector<32x128xf32>, vector<32x128xf32> -> vector<32x128xf32>
    %33 = arith.addf %30, %32 : vector<32x128xf32>
    %c0_11 = arith.constant 0 : index
    %c0_12 = arith.constant 0 : index
    %34 = vector.load %arg4[%c0_11, %c0_12] : memref<1x128xf32, #tpu.memory_space<vmem>>, vector<1x128xf32>
    %35 = vector.broadcast %34 : vector<1x128xf32> to vector<32x128xf32>
    %36 = arith.addf %33, %35 : vector<32x128xf32>
    %37 = vector.extract_strided_slice %36 {offsets = [0, 0], sizes = [8, 128], strides = [1, 1]} : vector<32x128xf32> to vector<8x128xf32>
    %c0_13 = arith.constant 0 : index
    %c0_14 = arith.constant 0 : index
    %c0_15 = arith.constant 0 : index
    %38 = vector.load %arg5[%c0_13, %c0_14, %c0_15] : memref<2x8x128xf32, #tpu.memory_space<vmem>>, vector<1x8x128xf32>
    %39 = vector.shape_cast %38 : vector<1x8x128xf32> to vector<8x128xf32>
    %40 = vector.shape_cast %37 : vector<8x128xf32> to vector<1x8x128xf32>
    tpu.vector_store %arg5[%c0_13, %c0_14, %c0_15], %40 {strides = array<i32>} : memref<2x8x128xf32, #tpu.memory_space<vmem>>, vector<1x8x128xf32>,
    %41 = vector.extract_strided_slice %36 {offsets = [16, 0], sizes = [8, 128], strides = [1, 1]} : vector<32x128xf32> to vector<8x128xf32>
    %c1 = arith.constant 1 : index
    %c0_16 = arith.constant 0 : index
    %c0_17 = arith.constant 0 : index
    %42 = vector.load %arg5[%c1, %c0_16, %c0_17] : memref<2x8x128xf32, #tpu.memory_space<vmem>>, vector<1x8x128xf32>
    %43 = vector.shape_cast %42 : vector<1x8x128xf32> to vector<8x128xf32>
    %44 = vector.shape_cast %41 : vector<8x128xf32> to vector<1x8x128xf32>
    tpu.vector_store %arg5[%c1, %c0_16, %c0_17], %44 {strides = array<i32>} : memref<2x8x128xf32, #tpu.memory_space<vmem>>, vector<1x8x128xf32>,
    return
  }
}

</mosaic_0001>

<bundles_post_ra>
// kernel: tpu_custom_call.1
= control target key start
LH: loop header
LB: loop body
LE: loop exit
PB: predicated region body
PF: predicated region fallthrough
CT: control target
= control target key end

     0   :  { %v789_v2 = vmov 0   ;;  %v790_v14 = vmov 1   ;;  %s965_s0 = inlined_call_operand.vmem [shape: s32[32,2], index: 0, kind: input, shape index: {}]   ;;  %s966_s1 = inlined_call_operand.vmem [shape: f32[128,32], index: 1, kind: input, shape index: {}]   ;;  %s967_s2 = inlined_call_operand.vmem [shape: f32[1,32], index: 2, kind: input, shape index: {}]   ;;  %s968_s3 = inlined_call_operand.vmem [shape: f32[64,128], index: 3, kind: input, shape index: {}]   ;;  %s969_s4 = inlined_call_operand.vmem [shape: f32[1,128], index: 4, kind: input, shape index: {}]   ;;  %s970_s5 = inlined_call_operand.hbm [shape: f32[2,8,128], index: 5, kind: output, shape index: {}]  }
   0x1   :  { %v22_v0 = vld [vmem:[%s965_s0 + $0x8] sm:$0xff]  ;;  %v21_v1 = vld [vmem:[%s965_s0] sm:$0xff]  ;;  %754 = vset.pattern.permute.xlu1 %v789_v2  ;;  %752 = vset.pattern.permute.xlu0 %v789_v2  ;;  %v85_v6 = vld [vmem:[%s966_s1 + $0x10] sm:$0xff] }
   0x2   :  { %v83_v3 = vld [vmem:[%s966_s1] sm:$0xff]  ;;  %v84_v4 = vld [vmem:[%s966_s1 + $0x8] sm:$0xff]  ;;  %31 = vperm.xlu1 %754, %v22_v0   ;;  %28 = vperm.xlu0 %752, %v21_v1   ;;  %v86_v7 = vld [vmem:[%s966_s1 + $0x18] sm:$0xff]  ;;  %v52_v8 = vadd.s32 50, %v22_v0  ;;  %v51_v9 = vadd.s32 50, %v21_v1 }
   0x3   :  { %v690_v5 = vpack.c.bf16 %v84_v4, %v83_v3  ;;  %v87_v10 = vld [vmem:[%s966_s1 + $0x20] sm:$0xff]  ;;  %v88_v11 = vld [vmem:[%s966_s1 + $0x28] sm:$0xff]  ;;  %v23_v12 = vld [vmem:[%s965_s0 + $0x10] sm:$0xff]  ;;  %v694_v13 = vpack.c.bf16 %v86_v7, %v85_v6 }
   0x4   :  { %v698_v15 = vpack.c.bf16 %v88_v11, %v87_v10 }
   0x5   :  { %691 = vmatprep.subr.bf16.mxu0 %v690_v5 }
   0x6   :  { %693 = vmatpush3.bf16.msra.mxu0 %v690_v5  ;;  %755 = vset.pattern.permute.xlu1 %v790_v14 }
   0x7   :  { %753 = vset.pattern.permute.xlu0 %v790_v14 }
   0x8   :  { %10 = vsyncpa [#allocation3], 0  ;;  %59 = vperm.xlu1 %755, %v52_v8   ;;  %56 = vperm.xlu0 %753, %v51_v9   ;;  %v53_v16 = vadd.s32 50, %v23_v12  ;;  %v89_v17 = vld [vmem:[%s966_s1 + $0x30] sm:$0xff]  ;;  %v90_v18 = vld [vmem:[%s966_s1 + $0x38] sm:$0xff]  ;;  %v25_v34 = vlaneseq  ;;  %v791_v40 = vmov 0.0  }
   0x9   :  { %v24_v19 = vld [vmem:[%s965_s0 + $0x18] sm:$0xff]  ;;  %695 = vmatprep.subr.bf16.mxu0 %v694_v13  ;;  %v702_v20 = vpack.c.bf16 %v90_v18, %v89_v17  ;;  %v91_v22 = vld [vmem:[%s966_s1 + $0x40] sm:$0xff]  ;;  %v92_v23 = vld [vmem:[%s966_s1 + $0x48] sm:$0xff]  ;;  %vm216_vm9 = vcmask 261120   ;;  %s792_s23 = smov [#allocation2]  }
   0xa   :  { %697 = vmatpush3.bf16.msra.mxu0 %v694_v13  ;;  %v54_v21 = vadd.s32 50, %v24_v19  ;;  %v706_v24 = vpack.c.bf16 %v92_v23, %v91_v22  ;;  %v93_v25 = vld [vmem:[%s966_s1 + $0x50] sm:$0xff]  ;;  %v94_v26 = vld [vmem:[%s966_s1 + $0x58] sm:$0xff]  ;;  %v95_v28 = vld [vmem:[%s966_s1 + $0x60] sm:$0xff]  ;;  %v885_v35 = vand.u32 127, %v25_v34  ;;  %v196_v57 = vshrl.u32 %v25_v34, 7 }
   0xb   :  { %699 = vmatprep.subr.bf16.mxu0 %v698_v15  ;;  %v710_v27 = vpack.c.bf16 %v94_v26, %v93_v25  ;;  %v96_v29 = vld [vmem:[%s966_s1 + $0x68] sm:$0xff]  ;;  %v97_v31 = vld [vmem:[%s966_s1 + $0x70] sm:$0xff]  ;;  %v98_v32 = vld [vmem:[%s966_s1 + $0x78] sm:$0xff]  ;;  %s529_s24 = sshll.u32 %s792_s23, 4  ;;  %s530_s24 = int_to_ptr.vmem [resolvable:$true] %s529_s24 }
   0xc   :  { %756 = vset.pattern.permute.xlu1 %v789_v2  ;;  %62 = vperm.xlu0 %753, %v53_v16   ;;  %v714_v30 = vpack.c.bf16 %v96_v29, %v95_v28  ;;  %v718_v33 = vpack.c.bf16 %v98_v32, %v97_v31  ;;  %v200_v58 = vadd.s32 1, %v196_v57  ;;  %v548_v60 = vld [vmem:[%s967_s2] ss:$0 sm:$0xff]  ;;  %v197_v8 = vadd.s32 8, %v196_v57  ;;  %v319_v14 = vld [vmem:[%s968_s3 + $0x28] sm:$0xff]  ;;  %v316_v29 = vld [vmem:[%s968_s3 + $0x10] sm:$0xff]  ;;  %p770_p1 = scmp.lt.s32.totalorder %s530_s24, %s530_s24 }
   0xd   :  { %34 = vperm.xlu1 %756, %v23_v12   ;;  %v198_v9 = vadd.s32 16, %v196_v57  ;;  %v199_v11 = vadd.s32 24, %v196_v57  ;;  %v318_v13 = vld [vmem:[%s968_s3 + $0x20] sm:$0xff]  ;;  %s765_s25 = scalar_lea.vmem %s530_s24, 256 }
   0xe   :  { %701 = vmatpush3.bf16.msra.mxu0 %v698_v15  ;;  %vm204_vm8 = vcmp.eq.s32.totalorder %v885_v35, %v200_v58  ;;  %v201_v10 = vadd.s32 1, %v197_v8  ;;  %v314_v26 = vld [vmem:[%s968_s3] sm:$0xff]  ;;  %p766_p0 = scmp.ne.s32.totalorder %s530_s24, %s765_s25  ;;  %p771_p2 = scmp.lt.s32.totalorder %s765_s25, %s765_s25 }
   0xf   :  { %703 = vmatprep.subr.bf16.mxu0 %v702_v20  ;;  %v549_v59 = vsel %vm204_vm8, 1.0, %v791_v40  ;;  %v202_v12 = vadd.s32 1, %v198_v9  ;;  %v203_v18 = vadd.s32 1, %v199_v11 }
  0x10   :  { %65 = vperm.xlu0 %753, %v54_v21   ;;  %656 = vmatprep.mubr.msk.f32.mxu1 %vm216_vm9, %v549_v59  ;;  %vm205_vm10 = vcmp.eq.s32.totalorder %v885_v35, %v201_v10  ;;  %v321_v21 = vld [vmem:[%s968_s3 + $0x38] sm:$0xff]  ;;  %p772_p3 = por %p771_p2, %p770_p1 }
  0x11   :  { %37 = vperm.xlu1 %756, %v24_v19   ;;  %v730_v19 = vpack.c.bf16 %v319_v14, %v318_v13  ;;  %vm206_vm11 = vcmp.eq.s32.totalorder %v885_v35, %v202_v12  ;;  %v550_v22 = vsel %vm205_vm10, 1.0, %v791_v40  ;;  %vm207_vm12 = vcmp.eq.s32.totalorder %v885_v35, %v203_v18 }
  0x12   :  { %705 = vmatpush3.bf16.msra.mxu0 %v702_v20  ;;  %v320_v20 = vld [vmem:[%s968_s3 + $0x30] sm:$0xff]  ;;  %v551_v23 = vsel %vm206_vm11, 1.0, %v791_v40  ;;  %v552_v25 = vsel %vm207_vm12, 1.0, %v791_v40  ;;  %p773_p4 = pnand %p772_p3, %p766_p0 }
  0x13   :  { %707 = vmatprep.subr.bf16.mxu0 %v706_v24 }
  0x16   :  { %709 = vmatpush3.bf16.msra.mxu0 %v706_v24  ;;  %v734_v24 = vpack.c.bf16 %v321_v21, %v320_v20 }
  0x17   :  { %711 = vmatprep.subr.bf16.mxu0 %v710_v27 }
  0x1a   :  { %713 = vmatpush3.bf16.msra.mxu0 %v710_v27  ;;  %v315_v27 = vld [vmem:[%s968_s3 + $0x8] sm:$0xff] }
  0x1b   :  { %715 = vmatprep.subr.bf16.mxu0 %v714_v30  ;;  %v738_v28 = vpack.c.bf16 %v315_v27, %v314_v26 }
  0x1e   :  { %717 = vmatpush3.bf16.msra.mxu0 %v714_v30  ;;  %v317_v30 = vld [vmem:[%s968_s3 + $0x18] sm:$0xff] }
  0x1f   :  { %719 = vmatprep.subr.bf16.mxu0 %v718_v33 }
  0x22   :  { %721 = vmatpush3.bf16.msra.mxu0 %v718_v33  ;;  %v742_v33 = vpack.c.bf16 %v317_v30, %v316_v29 }
  0x81   :  { %v32_v36 = vpop.permute.xlu1 %31  ;;  %v29_v37 = vpop.permute.xlu0 %28 }
  0x82   :  { %vm40_vm0 = vcmp.eq.s32.totalorder %v32_v36, %v885_v35  ;;  %vm39_vm1 = vcmp.eq.s32.totalorder %v29_v37, %v885_v35 }
  0x83   :  { %v541_v41 = vsel %vm40_vm0, 1.0, %v791_v40  ;;  %v540_v43 = vsel %vm39_vm1, 1.0, %v791_v40 }
  0x87   :  { %v60_v38 = vpop.permute.xlu1 %59  ;;  %v57_v39 = vpop.permute.xlu0 %56 }
  0x88   :  { %vm68_vm2 = vcmp.eq.s32.totalorder %v60_v38, %v885_v35  ;;  %vm67_vm3 = vcmp.eq.s32.totalorder %v57_v39, %v885_v35 }
  0x89   :  { %v545_v42 = vsel %vm68_vm2, 1.0, %v791_v40  ;;  %v544_v44 = vsel %vm67_vm3, 1.0, %v791_v40 }
  0x8a   :  { %v80_v45 = vadd.f32 %v545_v42, %v541_v41  ;;  %v79_v46 = vadd.f32 %v544_v44, %v540_v43  ;;  %v565_v42 = vld [vmem:[%s969_s4] ss:$0 sm:$0xff] }
  0x8b   :  { %v63_v47 = vpop.permute.xlu0 %62 }
  0x8c   :  { %vm69_vm4 = vcmp.eq.s32.totalorder %v63_v47, %v885_v35  ;;  %v35_v48 = vpop.permute.xlu1 %34  ;;  %642 = vmatprep.mubr.f32.mxu0 %v79_v46 }
  0x8d   :  { %v546_v49 = vsel %vm69_vm4, 1.0, %v791_v40  ;;  %vm41_vm5 = vcmp.eq.s32.totalorder %v35_v48, %v885_v35  ;;  %643 = vmatmul.mubr.f32.vlgmr.msra.gmra.mrb[0].mxu0 %v80_v45 }
  0x8e   :  { %v542_v50 = vsel %vm41_vm5, 1.0, %v791_v40 }
  0x8f   :  { %v81_v51 = vadd.f32 %v546_v49, %v542_v50  ;;  %v66_v52 = vpop.permute.xlu0 %65 }
  0x90   :  { %vm70_vm6 = vcmp.eq.s32.totalorder %v66_v52, %v885_v35  ;;  %v38_v53 = vpop.permute.xlu1 %37 }
  0x91   :  { %v547_v54 = vsel %vm70_vm6, 1.0, %v791_v40  ;;  %vm42_vm7 = vcmp.eq.s32.totalorder %v38_v53, %v885_v35  ;;  %645 = vmatprep.mubr.f32.mxu0 %v81_v51 }
  0x92   :  { %v543_v55 = vsel %vm42_vm7, 1.0, %v791_v40 }
  0x93   :  { %v82_v56 = vadd.f32 %v547_v54, %v543_v55 }
  0x95   :  { %646 = vmatmul.mubr.f32.gmra.mrb[2].mxu0 %v82_v56 }
 0x160   :  { %v644_v61 = vpop.f32.mrb[0].mxu0 }
 0x161   :  { %v178_v62 = vadd.f32 %v644_v61, %v548_v60  ;;  %v172_v63 = vpop.f32.mrb[1].mxu0 }
 0x162   :  { %v173_v0 = vadd.f32 %v548_v60, %v172_v63 }
 0x163   :  { %757 = vtanh.f32 %v178_v62 }
 0x164   :  { %759 = vtanh.f32 %v173_v0 }
 0x168   :  { %v647_v1 = vpop.f32.mrb[2].mxu0 }
 0x169   :  { %v188_v2 = vadd.f32 %v647_v1, %v548_v60  ;;  %v182_v3 = vpop.f32.mrb[3].mxu0 }
 0x16a   :  { %v183_v4 = vadd.f32 %v548_v60, %v182_v3 }
 0x16b   :  { %761 = vtanh.f32 %v188_v2 }
 0x16c   :  { %763 = vtanh.f32 %v183_v4 }
 0x16d   :  { %v758_v5 = vpop.eup %757 }
 0x16e   :  { %v760_v6 = vpop.eup %759 }
 0x16f   :  { %v722_v7 = vpack.c.bf16 %v758_v5, %v760_v6 }
 0x171   :  { %723 = vmatprep.subr.bf16.mxu1 %v722_v7 }
 0x172   :  { %725 = vmatpush3.bf16.msra.mxu1 %v722_v7 }
 0x175   :  { %v762_v15 = vpop.eup %761 }
 0x176   :  { %v764_v16 = vpop.eup %763 }
 0x177   :  { %v726_v17 = vpack.c.bf16 %v762_v15, %v764_v16 }
 0x179   :  { %727 = vmatprep.subr.bf16.mxu1 %v726_v17 }
 0x17a   :  { %729 = vmatpush3.bf16.msra.mxu1 %v726_v17 }
 0x17b   :  { %731 = vmatprep.subr.bf16.mxu1 %v730_v19 }
 0x17d   :  { %657 = vmatmul.mubr.msk.f32.vlgmr.msra.gmra.mrb[0].mxu1 %vm216_vm9, %v550_v22 }
 0x17e   :  { %659 = vmatprep.mubr.msk.f32.mxu1 %vm216_vm9, %v551_v23  ;;  %733 = vmatpush3.bf16.msra.mxu1 %v730_v19 }
 0x17f   :  { %735 = vmatprep.subr.bf16.mxu1 %v734_v24 }
 0x181   :  { %660 = vmatmul.mubr.msk.f32.gmra.mrb[2].mxu1 %vm216_vm9, %v552_v25 }
 0x182   :  { %737 = vmatpush3.bf16.msra.mxu1 %v734_v24 }
 0x183   :  { %739 = vmatprep.subr.bf16.mxu1 %v738_v28 }
 0x250   :  { %v658_v31 = vpop.f32.mrb[0].mxu1 }
 0x251   :  { %v295_v32 = vpop.f32.mrb[1].mxu1 }
 0x252   :  { %670 = vmatprep.mubr.msk.f32.mxu1 %vm216_vm9, %v295_v32 }
 0x253   :  { %671 = vmatmul.mubr.msk.f32.vlgmr.msra.gmra.mrb[4].mxu1 %vm216_vm9, %v658_v31 }
 0x254   :  { %741 = vmatpush3.bf16.msra.mxu1 %v738_v28  ;;  %v661_v34 = vpop.f32.mrb[2].mxu1 }
 0x255   :  { %v305_v35 = vpop.f32.mrb[3].mxu1  ;;  %743 = vmatprep.subr.bf16.mxu1 %v742_v33 }
 0x256   :  { %673 = vmatprep.mubr.msk.f32.mxu1 %vm216_vm9, %v305_v35 }
 0x257   :  { %674 = vmatmul.mubr.msk.f32.gmra.mrb[6].mxu1 %vm216_vm9, %v661_v34 }
 0x258   :  { %745 = vmatpush3.bf16.msra.mxu1 %v742_v33  ;;  %684 = vmatprep.mubr.msk.f32.mxu1 %vm216_vm9, %v760_v6 }
 0x25b   :  { %685 = vmatmul.mubr.msk.f32.vlgmr.msra.gmra.mrb[8].mxu1 %vm216_vm9, %v758_v5 }
 0x25c   :  { %687 = vmatprep.mubr.msk.f32.mxu1 %vm216_vm9, %v764_v16 }
 0x25f   :  { %688 = vmatmul.mubr.msk.f32.gmra.mrb[10].mxu1 %vm216_vm9, %v762_v15 }
 0x326   :  { %v672_v36 = vpop.f32.mrb[4].mxu1 }
 0x327   :  { %v400_v37 = vpop.f32.mrb[5].mxu1 }
 0x32a   :  { %v675_v38 = vpop.f32.mrb[6].mxu1 }
 0x32b   :  { %v409_v39 = vpop.f32.mrb[7].mxu1 }
 0x32e   :  { %v686_v40 = vpop.f32.mrb[8].mxu1 }
 0x32f   :  { %v495_v41 = vpop.f32.mrb[9].mxu1 }
 0x330   :  { %v496_v43 = vadd.f32 %v495_v41, %v400_v37 }
 0x332   :  { %v519_v44 = vadd.f32 %v565_v42, %v496_v43  ;;  %v689_v45 = vpop.f32.mrb[10].mxu1 }
 0x333   :  { %v504_v46 = vpop.f32.mrb[11].mxu1 }
 0x334   :  { %521 = vst [vmem:[#allocation2] sm:$0xff] %v519_v44  ;;  %v505_v47 = vadd.f32 %v504_v46, %v409_v39 }
 0x336   :  { %v520_v48 = vadd.f32 %v565_v42, %v505_v47 }
 0x338   :  { %523 = vst [vmem:[#allocation2 + $0x8] sm:$0xff] %v520_v48 }
 0x339   :  { %776 = shalt.err (!%p773_p4)
}
 0x33a   :  { %s777_s27 = scalar_lea.hbm %s970_s5, 256 }
 0x33b   :  { %p778_p5 = scmp.ne.s32.totalorder %s970_s5, %s777_s27  ;;  %p781_p6 = scmp.lt.u32.totalorder %s777_s27, %s970_s5 }
 0x33d   :  { %p783_p7 = pnand %p781_p6, %p778_p5 }
 0x33f   :  { %786 = shalt.err (!%p783_p7)
}
 0x340   :  { %s793_s1 = smov 128   ;;  %s794_s7 = smov 8  }
 0x341   :  { %535 = dma.vmem_to_hbm [thread:$0]  %s530_s24, 256, %s970_s5, [#allocation3], %s793_s1, %s793_s1, %s794_s7  }
 0x342   :  { %787 = dma.done.wait [#allocation3], 256  }
 0x343   :  { %788 = vsyncadd [#allocation3], 4294967040 }
 0x344   :  { %539 = vsyncpa [#allocation3], 1 }

</bundles_post_ra>
